<compile_context>
chip_gen: v6e
topology: v6e:2x2x1
jax: 0.10.0
libtpu: 0.0.40
codegen_flags: <defaults>
</compile_context>

<pallas_src>
import functools

import jax
import jax.numpy as jnp
from jax.experimental import pallas as pl
from jax.experimental.pallas import tpu as pltpu


_LANE = 128            # TPU lane width: narrow last dims are padded to this in VMEM
_DEFAULT_TILE_M = 8192  # default row tile (multiple of 128); amortizes per-step overhead


def _round_up(x, m):
    return ((x + m - 1) // m) * m


def _fc_kernel(x_ref, w_ref, b_ref, o_ref):
    """One grid step: o = x @ W + b for this row tile (natural orientation)."""
    x = x_ref[...]            # (tm, K)   row tile of the flattened encoder output
    w = w_ref[...]            # (K, Np)   resident weight (matches x dtype)
    b = b_ref[...]            # (1, Np)   resident f32 bias row
    acc = jnp.dot(x, w, preferred_element_type=jnp.float32)   # (tm, Np), f32 accumulation
    o_ref[...] = (acc + b).astype(o_ref.dtype)


@functools.partial(jax.jit, static_argnames=("tile_m",))
def baseline_fc(enc, weight, bias, *, tile_m=None):
    """Pallas nn.Linear(enc_dim, n_pred) applied along the last dim of `enc`.

    enc:    [..., enc_dim]   (dtype defines the HBM traffic dtype of the dominant
                              x stream; bf16 enc -> bf16 traffic, f32 accumulation)
    weight: [enc_dim, n_pred]   (already transposed from torch's [n_pred, enc_dim])
    bias:   [n_pred]
    returns [..., n_pred]   (same dtype as enc)
    """
    *lead, K = enc.shape
    Np = weight.shape[-1]
    M = 1
    for d in lead:
        M *= d
    M = max(M, 1)

    out_dtype = enc.dtype
    x2d = enc.reshape(M, K)
    # Weight/bias are tiny (K*Np, Np): casting them is negligible; x is never
    # cast in the wrapper (that would be a full extra HBM pass).
    w = weight.astype(enc.dtype)                    # (K, Np) — VMEM resident
    b2d = bias.astype(jnp.float32).reshape(1, Np)   # (1, Np) — VMEM resident, f32

    # Row-tile selection.
    if tile_m is None:
        if M <= _DEFAULT_TILE_M:
            # Whole problem in a single block equal to the full array: no
            # boundary handling, no padding, one DMA + one step.
            tm = M
        else:
            tm = _DEFAULT_TILE_M
    else:
        if tile_m % 128 != 0:
            raise ValueError("tile_m must be a multiple of 128")
        tm = tile_m

    # Ragged M: no wrapper-side padding.  Pallas boundary blocks read the tail
    # tile (out-of-bounds rows are undefined) and mask the writeback to the
    # valid rows of the (M, Np) output, so no slicing is needed either.
    grid = (pl.cdiv(M, tm),)

    # Scoped-VMEM budget: the K=32 input block and Np=8 output block are both
    # lane-padded to 128 in VMEM, so each double-buffered stream costs
    # 2 * tm * 128 * itemsize bytes.  Raise the limit to cover that plus
    # headroom for the resident weight/bias and Mosaic internals.
    per_buf = tm * _LANE * (jnp.dtype(enc.dtype).itemsize
                            + jnp.dtype(out_dtype).itemsize)
    vmem_limit = int(max(32 << 20, 2 * per_buf + (4 << 20)))

    out2d = pl.pallas_call(
        _fc_kernel,
        out_shape=jax.ShapeDtypeStruct((M, Np), out_dtype),
        grid_spec=pltpu.PrefetchScalarGridSpec(
            num_scalar_prefetch=0,
            grid=grid,
            in_specs=[
                pl.BlockSpec((tm, K), lambda i: (i, 0)),   # x row tile (contiguous HBM DMA)
                pl.BlockSpec((K, Np), lambda i: (0, 0)),   # W (resident, never re-DMA'd)
                pl.BlockSpec((1, Np), lambda i: (0, 0)),   # bias (resident)
            ],
            out_specs=pl.BlockSpec((tm, Np), lambda i: (i, 0)),
        ),
        compiler_params=pltpu.CompilerParams(
            # Independent row tiles -> megacore / multi-TC can shard the grid axis.
            dimension_semantics=("parallel",),
            vmem_limit_bytes=vmem_limit,
        ),
    )(x2d, w, b2d)

    return out2d.reshape(*lead, Np)


def reference_fc(enc, weight, bias):
    return jnp.einsum("...k,kn->...n", enc, weight) + bias


if __name__ == "__main__":
    key = jax.random.PRNGKey(0)
    k_x, k_w, k_b, k_x2 = jax.random.split(key, 4)

    # Small synthetic config: batch=2, nodes=8, enc_dim=32, n_pred=8.
    B, N, ENC_DIM, N_PRED = 2, 8, 32, 8

    # batch['anchor_x'] stand-in; encoder is identity (see TODO above).
    anchor_x = jax.random.normal(k_x, (B, N, ENC_DIM), dtype=jnp.float32)

    # Deterministic nn.Linear-style init (uniform in +/- 1/sqrt(enc_dim)).
    bound = 1.0 / (ENC_DIM ** 0.5)
    weight = jax.random.uniform(k_w, (ENC_DIM, N_PRED), jnp.float32, -bound, bound)
    bias = jax.random.uniform(k_b, (N_PRED,), jnp.float32, -bound, bound)

    enc = anchor_x  # encoder(anchor_x) placeholder (identity)

    # 1) Small case: single full-array block (tm == M == 16), f32.
    out = baseline_fc(enc, weight, bias)
    out = jax.block_until_ready(out)
    ref = reference_fc(enc, weight, bias)
    assert out.shape == (B, N, N_PRED), out.shape
    assert jnp.allclose(out, ref, atol=1e-5, rtol=1e-5), "mismatch vs reference"

    # 2) Ragged M + multi-step grid (M=400, tile_m=128 -> grid of 4 with a
    #    partial boundary block) to exercise pipelining and masked tail writes.
    B2, N2 = 2, 200
    anchor_x2 = jax.random.normal(k_x2, (B2, N2, ENC_DIM), dtype=jnp.float32)
    out2 = baseline_fc(anchor_x2, weight, bias, tile_m=128)
    out2 = jax.block_until_ready(out2)
    ref2 = reference_fc(anchor_x2, weight, bias)
    assert out2.shape == (B2, N2, N_PRED), out2.shape
    assert jnp.allclose(out2, ref2, atol=1e-5, rtol=1e-5), "mismatch vs reference (ragged)"

    # 3) bf16 HBM traffic path: enc already bf16 (as a bf16 encoder would
    #    produce); kernel keeps f32 accumulation.  Parity-sensitive runs should
    #    feed f32 enc instead.
    enc_bf16 = anchor_x2.astype(jnp.bfloat16)
    out3 = baseline_fc(enc_bf16, weight, bias, tile_m=128)
    out3 = jax.block_until_ready(out3)
    ref3 = reference_fc(enc_bf16.astype(jnp.float32),
                        weight.astype(jnp.bfloat16).astype(jnp.float32), bias)
    assert out3.shape == (B2, N2, N_PRED), out3.shape
    assert jnp.allclose(out3.astype(jnp.float32), ref3, atol=2e-2, rtol=2e-2), \
        "mismatch vs reference (bf16)"

    print("KERNEL_OK")
</pallas_src>

<mosaic_0001>
module attributes {stable_mosaic.version = 11 : i64} {
  func.func @_fc_kernel(%arg0: i32, %arg1: memref<16x32xf32, #tpu.memory_space<vmem>>, %arg2: memref<32x8xf32, #tpu.memory_space<vmem>>, %arg3: memref<1x8xf32, #tpu.memory_space<vmem>>, %arg4: memref<16x8xf32, #tpu.memory_space<vmem>>) attributes {dimension_semantics = [#tpu.dimension_semantics<parallel>], iteration_bounds = array<i64: 1>, scalar_prefetch = 0 : i64, scratch_operands = 0 : i64, tpu.core_type = #tpu.core_type<tc>, window_params = [{transform_indices = @transform_0, window_bounds = array<i64: 16, 32>}, {pipeline_mode = #tpu.pipeline_mode<synchronous>, transform_indices = @transform_1, window_bounds = array<i64: 32, 8>}, {pipeline_mode = #tpu.pipeline_mode<synchronous>, transform_indices = @transform_2, window_bounds = array<i64: 1, 8>}, {transform_indices = @transform_3, window_bounds = array<i64: 16, 8>}]} {
    %c0 = arith.constant 0 : index
    %c0_0 = arith.constant 0 : index
    %0 = vector.load %arg1[%c0, %c0_0] : memref<16x32xf32, #tpu.memory_space<vmem>>, vector<16x32xf32>
    %c0_1 = arith.constant 0 : index
    %c0_2 = arith.constant 0 : index
    %1 = vector.load %arg2[%c0_1, %c0_2] : memref<32x8xf32, #tpu.memory_space<vmem>>, vector<32x8xf32>
    %c0_3 = arith.constant 0 : index
    %c0_4 = arith.constant 0 : index
    %2 = vector.load %arg3[%c0_3, %c0_4] : memref<1x8xf32, #tpu.memory_space<vmem>>, vector<1x8xf32>
    %cst = arith.constant dense<0.000000e+00> : vector<16x8xf32>
    %3 = tpu.matmul %0, %1, %cst {dimension_numbers = #tpu.dot_dimension_numbers<[1], [0], [0], [1], [0, 0, 1, 1], [], []>} : vector<16x32xf32>, vector<32x8xf32>, vector<16x8xf32> -> vector<16x8xf32>
    %4 = vector.broadcast %2 : vector<1x8xf32> to vector<16x8xf32>
    %5 = arith.addf %3, %4 : vector<16x8xf32>
    %c0_5 = arith.constant 0 : index
    %c0_6 = arith.constant 0 : index
    %6 = vector.load %arg4[%c0_5, %c0_6] : memref<16x8xf32, #tpu.memory_space<vmem>>, vector<16x8xf32>
    tpu.vector_store %arg4[%c0_5, %c0_6], %5 {strides = array<i32>} : memref<16x8xf32, #tpu.memory_space<vmem>>, vector<16x8xf32>,
    return
  }
  func.func @transform_0(%arg0: i32) -> (i32, i32) {
    %c0_i32 = arith.constant 0 : i32
    %c0_i32_0 = arith.constant 0 : i32
    return %arg0, %c0_i32 : i32, i32
  }
  func.func @transform_1(%arg0: i32) -> (i32, i32) {
    %c0_i32 = arith.constant 0 : i32
    %c0_i32_0 = arith.constant 0 : i32
    %c0_i32_1 = arith.constant 0 : i32
    return %c0_i32, %c0_i32_0 : i32, i32
  }
  func.func @transform_2(%arg0: i32) -> (i32, i32) {
    %c0_i32 = arith.constant 0 : i32
    %c0_i32_0 = arith.constant 0 : i32
    %c0_i32_1 = arith.constant 0 : i32
    return %c0_i32, %c0_i32_0 : i32, i32
  }
  func.func @transform_3(%arg0: i32) -> (i32, i32) {
    %c0_i32 = arith.constant 0 : i32
    %c0_i32_0 = arith.constant 0 : i32
    return %arg0, %c0_i32 : i32, i32
  }
}

</mosaic_0001>

<bundles_post_ra>
// kernel: baseline_fc.1
= control target key start
LH: loop header
LB: loop body
LE: loop exit
PB: predicated region body
PF: predicated region fallthrough
CT: control target
= control target key end

     0   :  { %vm28_vm0 = vcmask 261120   ;;  %s221_s0 = inlined_call_operand.vmem [shape: f32[16,32], index: 0, kind: input, shape index: {}]   ;;  %s222_s1 = inlined_call_operand.vmem [shape: f32[32,8], index: 1, kind: input, shape index: {}]   ;;  %s223_s2 = inlined_call_operand.vmem [shape: f32[1,8], index: 2, kind: input, shape index: {}]   ;;  %s224_s3 = inlined_call_operand.hbm [shape: f32[16,8], index: 3, kind: output, shape index: {}]  }
   0x1   :  { %v20_v0 = vld [vmem:[%s222_s1 + $0x18] sm:$0xff]  ;;  %v19_v1 = vld [vmem:[%s222_s1 + $0x10] sm:$0xff]  ;;  %v15_v2 = vld [vmem:[%s221_s0] sm:$0xff] }
   0x2   :  { %138 = vmatprep.subr.mxu0 %v20_v0  ;;  %v18_v3 = vld [vmem:[%s222_s1 + $0x8] sm:$0xff]  ;;  %146 = vmatprep.mubr.msk.f32.mxu0 %vm28_vm0, %v15_v2 }
   0x3   :  { %139 = vmatpush3.msra.mxu0 %v20_v0 }
   0x4   :  { %8 = vsyncpa [#allocation3], 0  ;;  %140 = vmatprep.subr.mxu0 %v19_v1  ;;  %v17_v4 = vld [vmem:[%s222_s1] sm:$0xff]  ;;  %v16_v5 = vld [vmem:[%s221_s0 + $0x8] sm:$0xff]  ;;  %s174_s26 = smov [#allocation2]   ;;  %vm110_vm1 = vcmask 64512  }
   0x5   :  { %141 = vmatpush3.msra.mxu0 %v19_v1  ;;  %v129_v6 = vld [vmem:[%s223_s2] ss:$0 sm:$0xff]  ;;  %s118_s27 = sshll.u32 %s174_s26, 4  ;;  %s119_s27 = int_to_ptr.vmem [resolvable:$true] %s118_s27 }
   0x6   :  { %142 = vmatprep.subr.mxu0 %v18_v3  ;;  %s152_s1 = scalar_lea.vmem %s119_s27, 256  ;;  %p157_p1 = scmp.lt.s32.totalorder %s119_s27, %s119_s27 }
   0x7   :  { %143 = vmatpush3.msra.mxu0 %v18_v3  ;;  %p153_p0 = scmp.ne.s32.totalorder %s119_s27, %s152_s1  ;;  %p158_p2 = scmp.lt.s32.totalorder %s152_s1, %s152_s1 }
   0x8   :  { %144 = vmatprep.subr.mxu0 %v17_v4 }
   0x9   :  { %145 = vmatpush3.msra.mxu0 %v17_v4  ;;  %p159_p3 = por %p158_p2, %p157_p1 }
   0xa   :  { %147 = vmatmul.mubr.msk.f32.vlgmr.msra.gmra.mxu0 %vm28_vm0, %v16_v5 }
   0xb   :  { %p160_p4 = pnand %p159_p3, %p153_p0 }
  0xca   :  { %v148_v7 = vpop.f32.mrf.mxu0 }
  0xcb   :  { %v107_v8 = vadd.f32 %v148_v7, %v129_v6 }
  0xcc   :  { %v101_v9 = vpop.f32.mrf.mxu0 }
  0xcd   :  { %112 = vst.msk [vmem:[#allocation2 + $0x8] sm:$0xff] %vm110_vm1, %v107_v8  ;;  %v102_v10 = vadd.f32 %v129_v6, %v101_v9 }
  0xcf   :  { %111 = vst.msk [vmem:[#allocation2] sm:$0xff] %vm110_vm1, %v102_v10 }
  0xd0   :  { %163 = shalt.err (!%p160_p4)
}
  0xd1   :  { %s175_s0 = smov 128   ;;  %s176_s28 = smov 8  }
  0xd2   :  { %124 = dma.vmem_to_hbm [thread:$0]  %s119_s27, 256, %s224_s3, [#allocation3], %s175_s0, %s175_s0, %s176_s28  }
  0xd3   :  { %172 = dma.done.wait [#allocation3], 256  }
  0xd4   :  { %173 = vsyncadd [#allocation3], 4294967040 }
  0xd5   :  { %128 = vsyncpa [#allocation3], 1 }

</bundles_post_ra>
